<compile_context>
chip_gen: v5e
topology: v5e:2x2
jax: 0.10.0
libtpu: 0.0.40
codegen_flags: <defaults>
</compile_context>

<pallas_src>
import functools
import math

import jax
import jax.numpy as jnp
from jax.experimental import pallas as pl
from jax.experimental.pallas import tpu as pltpu

_INV_SQRT2 = 0.7071067811865476
_SQRT_2_OVER_PI = 0.7978845608028654
_MIB = 1024 * 1024

_VMEM_CAP_CACHE = None


def _rup(a, m):
    return -(-a // m) * m


def _vmem_capacity_bytes():
    """Per-core VMEM capacity; conservative 64 MiB fallback if the query fails."""
    global _VMEM_CAP_CACHE
    if _VMEM_CAP_CACHE is None:
        cap = 0
        try:
            cap = int(getattr(pltpu.get_tpu_info(), "vmem_capacity_bytes", 0) or 0)
        except Exception:
            cap = 0
        _VMEM_CAP_CACHE = cap if cap > 0 else 64 * _MIB
    return _VMEM_CAP_CACHE


def _footprint_bytes(tm, th, Cp, Op, ib):
    """Approximate per-grid-step VMEM footprint (double-buffered BlockSpec tiles)."""
    fb = 2 * tm * Cp * ib        # x row tile
    fb += 2 * Cp * th * ib       # w1 hidden chunk
    fb += 2 * 8 * th * 4         # b1 chunk (sublane-padded, f32)
    fb += 2 * th * Op * ib       # w2 hidden chunk
    fb += 2 * 8 * Op * 4         # b2
    fb += 2 * tm * Op * ib       # output tile
    fb += tm * Op * 4            # f32 accumulator scratch
    fb += tm * th * 4            # f32 GELU intermediate
    return fb


def _gated_mlp_kernel(x_ref, w1_ref, b1_ref, w2_ref, b2_ref, o_ref, acc_ref,
                      *, approximate_gelu):
    k = pl.program_id(1)

    # fc1 chunk: (tm, Cp) @ (Cp, th) + b1[th]  (f32 accumulation on the MXU)
    h = jnp.dot(x_ref[...], w1_ref[...], preferred_element_type=jnp.float32)
    h = h + b1_ref[...].astype(jnp.float32)

    if approximate_gelu:
        # tanh-GELU (torch GELU(approximate='tanh')): transcendental goes to the
        # EUP slot instead of a multi-op VALU erf polynomial.
        h = 0.5 * h * (1.0 + jnp.tanh(_SQRT_2_OVER_PI * (h + 0.044715 * h * h * h)))
    else:
        # Exact erf form (torch.nn.GELU default).
        h = 0.5 * h * (1.0 + jax.lax.erf(h * _INV_SQRT2))

    # drop1(p=0) -> identity ; gate = Identity
    # fc2 partial product over this hidden chunk.
    part = jnp.dot(h.astype(w2_ref.dtype), w2_ref[...],
                   preferred_element_type=jnp.float32)

    @pl.when(k == 0)
    def _():
        # Fold accumulator init + fc2 bias into the first k-step.
        acc_ref[...] = part + b2_ref[...].astype(jnp.float32)

    @pl.when(k > 0)
    def _():
        acc_ref[...] += part

    @pl.when(k == pl.num_programs(1) - 1)
    def _():
        # drop2(p=0) -> identity
        o_ref[...] = acc_ref[...].astype(o_ref.dtype)


def prepare_gated_mlp_params(w1, b1, w2, b2, *, compute_dtype=jnp.bfloat16, th=None):
    """Pad/cast the Linear weights ONCE, outside the jitted hot path.

    w1: (in_features, hidden_features), w2: (hidden_features, out_features).
    Returns ((w1p, b1p, w2p, b2p), meta) where meta holds the static kwargs for
    gated_mlp_apply.
    """
    C, H = w1.shape
    Hw, O = w2.shape
    assert H == Hw and b1.shape == (H,) and b2.shape == (O,)

    cdt = jnp.dtype(compute_dtype)
    ib = cdt.itemsize
    cap = _vmem_capacity_bytes()
    budget = int(cap * 0.75)

    Cp = _rup(C, 128)
    if Cp != C and Cp % 256 != 0:
        # v6e/v7x MXU passes are 256 wide; since we pad anyway, pad to 256.
        Cp = _rup(C, 256)
    Op = _rup(O, 128)

    if th is None:
        th = 1024 if cap >= 96 * _MIB else 512
    th_eff = max(128, (min(th, _rup(H, 128)) // 128) * 128)
    # Shrink the hidden chunk until a nominal tm=512 step fits the VMEM budget.
    while th_eff > 128 and _footprint_bytes(512, th_eff, Cp, Op, ib) > budget:
        th_eff = max(128, ((th_eff // 2) // 128) * 128)
    Hp = _rup(H, th_eff)

    # Zero padding is exact through fc1/GELU/fc2 (GELU(0)=0, padded w2 rows are 0).
    w1p = jnp.pad(w1.astype(cdt), ((0, Cp - C), (0, Hp - H)))
    b1p = jnp.pad(b1.astype(jnp.float32), (0, Hp - H)).reshape(1, Hp)
    w2p = jnp.pad(w2.astype(cdt), ((0, Hp - H), (0, Op - O)))
    b2p = jnp.pad(b2.astype(jnp.float32), (0, Op - O)).reshape(1, Op)

    meta = dict(out_features=O, th=th_eff)
    return (w1p, b1p, w2p, b2p), meta


def gated_mlp_apply(x, w1p, b1p, w2p, b2p, *, out_features, th, tm=None,
                    approximate_gelu=True):
    """Hot path: x (..., in_features) -> (..., out_features) using pre-padded params."""
    *lead, C = x.shape
    Cp, Hp = w1p.shape
    Op = w2p.shape[1]
    O = out_features
    assert C <= Cp and w2p.shape[0] == Hp and Hp % th == 0

    cdt = w1p.dtype
    ib = jnp.dtype(cdt).itemsize
    cap = _vmem_capacity_bytes()
    budget = int(cap * 0.75)

    M = 1
    for d in lead:
        M *= d
    Mp = _rup(M, 8)

    if tm is None:
        tm = 512
    tm_eff = max(8, (min(tm, Mp) // 8) * 8)
    # Two-TensorCore chips (v7x-like, ~64 MiB VMEM/TC): ensure >=2 tiles on the
    # "parallel" M axis so both cores get work.
    if cap < 96 * _MIB and Mp >= 512:
        tm_eff = min(tm_eff, max(8, _rup(-(-Mp // 2), 8)))
    # Shrink the row tile until the per-step footprint fits the VMEM budget.
    while tm_eff > 8 and _footprint_bytes(tm_eff, th, Cp, Op, ib) > budget:
        tm_eff = max(8, ((tm_eff // 2) // 8) * 8)

    footprint = _footprint_bytes(tm_eff, th, Cp, Op, ib)
    # Never clamp the limit below the real requirement; otherwise leave headroom
    # under the physical capacity.
    vmem_limit = int(min(max(footprint + 8 * _MIB, 32 * _MIB), int(cap * 0.8)))
    vmem_limit = max(vmem_limit, footprint + 4 * _MIB)

    # Only pad the contraction (C) lanes and round rows to a sublane multiple;
    # the row-tile axis itself is ragged (pl.cdiv grid), not materialized.
    x2d = x.reshape(M, C).astype(cdt)
    if Mp != M or Cp != C:
        x2d = jnp.pad(x2d, ((0, Mp - M), (0, Cp - C)))

    grid = (pl.cdiv(Mp, tm_eff), Hp // th)

    kernel = functools.partial(_gated_mlp_kernel, approximate_gelu=approximate_gelu)
    out2d = pl.pallas_call(
        kernel,
        out_shape=jax.ShapeDtypeStruct((Mp, Op), cdt),
        grid_spec=pltpu.PrefetchScalarGridSpec(
            num_scalar_prefetch=0,
            grid=grid,
            in_specs=[
                pl.BlockSpec((tm_eff, Cp), lambda i, k: (i, 0)),   # x row tile (k-invariant)
                pl.BlockSpec((Cp, th), lambda i, k: (0, k)),       # w1 hidden chunk
                pl.BlockSpec((1, th), lambda i, k: (0, k)),        # b1 hidden chunk
                pl.BlockSpec((th, Op), lambda i, k: (k, 0)),       # w2 hidden chunk
                pl.BlockSpec((1, Op), lambda i, k: (0, 0)),        # b2 (grid-invariant)
            ],
            out_specs=pl.BlockSpec((tm_eff, Op), lambda i, k: (i, 0)),
            scratch_shapes=[pltpu.VMEM((tm_eff, Op), jnp.float32)],
        ),
        compiler_params=pltpu.CompilerParams(
            dimension_semantics=("parallel", "arbitrary"),
            vmem_limit_bytes=vmem_limit,
        ),
    )(x2d, w1p, b1p, w2p, b2p)

    out = out2d[:M, :O]
    return out.reshape(*lead, O)


def gated_mlp(x, w1, b1, w2, b2, *, tm=None, th=None,
              compute_dtype=jnp.bfloat16, approximate_gelu=True):
    """Convenience wrapper (pads weights per call). For repeated calls, use
    prepare_gated_mlp_params() once + gated_mlp_apply()."""
    (w1p, b1p, w2p, b2p), meta = prepare_gated_mlp_params(
        w1, b1, w2, b2, compute_dtype=compute_dtype, th=th)
    return gated_mlp_apply(x, w1p, b1p, w2p, b2p, tm=tm,
                           approximate_gelu=approximate_gelu, **meta)


def _reference(x, w1, b1, w2, b2):
    h = jnp.einsum("bnc,ch->bnh", x, w1) + b1
    h = 0.5 * h * (1.0 + jax.lax.erf(h / jnp.sqrt(2.0)))
    return jnp.einsum("bnh,ho->bno", h, w2) + b2


if __name__ == "__main__":
    # Small shapes consistent with the module: batch=2, seq=8, in_features=32, hidden=64.
    B, N, Cin = 2, 8, 32
    Hid = 64
    Cout = Cin  # out_features defaults to in_features

    key = jax.random.PRNGKey(0)
    kx, k1, kb1, k2, kb2 = jax.random.split(key, 5)

    bound1 = 1.0 / math.sqrt(Cin)
    bound2 = 1.0 / math.sqrt(Hid)
    x = jax.random.normal(kx, (B, N, Cin), dtype=jnp.float32)
    w1 = jax.random.uniform(k1, (Cin, Hid), minval=-bound1, maxval=bound1, dtype=jnp.float32)
    b1 = jax.random.uniform(kb1, (Hid,), minval=-bound1, maxval=bound1, dtype=jnp.float32)
    w2 = jax.random.uniform(k2, (Hid, Cout), minval=-bound2, maxval=bound2, dtype=jnp.float32)
    b2 = jax.random.uniform(kb2, (Cout,), minval=-bound2, maxval=bound2, dtype=jnp.float32)

    ref = _reference(x, w1, b1, w2, b2)

    # 1) Exact-semantics path: f32 compute, exact erf GELU (torch.nn.GELU default).
    out_f32 = jax.jit(functools.partial(
        gated_mlp, compute_dtype=jnp.float32, approximate_gelu=False))(x, w1, b1, w2, b2)
    out_f32 = jax.block_until_ready(out_f32)
    assert out_f32.shape == (B, N, Cout), out_f32.shape
    assert jnp.allclose(out_f32, ref, atol=1e-5, rtol=1e-5), \
        float(jnp.max(jnp.abs(out_f32 - ref)))

    # 2) Performance-default path: bf16 compute (f32 accumulation), tanh GELU,
    #    weights padded/cast once outside the jitted hot path.
    (w1p, b1p, w2p, b2p), meta = prepare_gated_mlp_params(w1, b1, w2, b2)
    fwd = jax.jit(functools.partial(gated_mlp_apply, **meta))
    out_bf16 = jax.block_until_ready(fwd(x, w1p, b1p, w2p, b2p)).astype(jnp.float32)
    assert out_bf16.shape == (B, N, Cout), out_bf16.shape
    assert jnp.allclose(out_bf16, ref, atol=5e-2, rtol=5e-2), \
        float(jnp.max(jnp.abs(out_bf16 - ref)))

    print("KERNEL_OK")
</pallas_src>

<mosaic_0001>
module attributes {stable_mosaic.version = 11 : i64} {
  func.func @_gated_mlp_kernel(%arg0: i32, %arg1: i32, %arg2: memref<16x256xf32, #tpu.memory_space<vmem>>, %arg3: memref<256x128xf32, #tpu.memory_space<vmem>>, %arg4: memref<1x128xf32, #tpu.memory_space<vmem>>, %arg5: memref<128x128xf32, #tpu.memory_space<vmem>>, %arg6: memref<1x128xf32, #tpu.memory_space<vmem>>, %arg7: memref<16x128xf32, #tpu.memory_space<vmem>>, %arg8: memref<16x128xf32, #tpu.memory_space<vmem>>) attributes {dimension_semantics = [#tpu.dimension_semantics<parallel>, #tpu.dimension_semantics<arbitrary>], iteration_bounds = array<i64: 1, 1>, scalar_prefetch = 0 : i64, scratch_operands = 1 : i64, tpu.core_type = #tpu.core_type<tc>, window_params = [{transform_indices = @transform_0, window_bounds = array<i64: 16, 256>}, {transform_indices = @transform_1, window_bounds = array<i64: 256, 128>}, {transform_indices = @transform_2, window_bounds = array<i64: 1, 128>}, {transform_indices = @transform_3, window_bounds = array<i64: 128, 128>}, {pipeline_mode = #tpu.pipeline_mode<synchronous>, transform_indices = @transform_4, window_bounds = array<i64: 1, 128>}, {transform_indices = @transform_5, window_bounds = array<i64: 16, 128>}]} {
    %c0 = arith.constant 0 : index
    %c0_0 = arith.constant 0 : index
    %0 = vector.load %arg2[%c0, %c0_0] : memref<16x256xf32, #tpu.memory_space<vmem>>, vector<16x256xf32>
    %c0_1 = arith.constant 0 : index
    %c0_2 = arith.constant 0 : index
    %1 = vector.load %arg3[%c0_1, %c0_2] : memref<256x128xf32, #tpu.memory_space<vmem>>, vector<256x128xf32>
    %cst = arith.constant dense<0.000000e+00> : vector<16x128xf32>
    %2 = tpu.matmul %0, %1, %cst {dimension_numbers = #tpu.dot_dimension_numbers<[1], [0], [0], [1], [0, 0, 1, 1], [], []>} : vector<16x256xf32>, vector<256x128xf32>, vector<16x128xf32> -> vector<16x128xf32>
    %c0_3 = arith.constant 0 : index
    %c0_4 = arith.constant 0 : index
    %3 = vector.load %arg4[%c0_3, %c0_4] : memref<1x128xf32, #tpu.memory_space<vmem>>, vector<1x128xf32>
    %4 = vector.broadcast %3 : vector<1x128xf32> to vector<16x128xf32>
    %5 = arith.addf %2, %4 : vector<16x128xf32>
    %cst_5 = arith.constant 5.000000e-01 : f32
    %6 = vector.broadcast %cst_5 : f32 to vector<16x128xf32>
    %7 = arith.mulf %6, %5 : vector<16x128xf32>
    %cst_6 = arith.constant 0.707106769 : f32
    %8 = vector.broadcast %cst_6 : f32 to vector<16x128xf32>
    %9 = arith.mulf %5, %8 : vector<16x128xf32>
    %10 = math.erf %9 : vector<16x128xf32>
    %cst_7 = arith.constant 1.000000e+00 : f32
    %11 = vector.broadcast %cst_7 : f32 to vector<16x128xf32>
    %12 = arith.addf %11, %10 : vector<16x128xf32>
    %13 = arith.mulf %7, %12 : vector<16x128xf32>
    %c0_8 = arith.constant 0 : index
    %c0_9 = arith.constant 0 : index
    %14 = vector.load %arg5[%c0_8, %c0_9] : memref<128x128xf32, #tpu.memory_space<vmem>>, vector<128x128xf32>
    %cst_10 = arith.constant dense<0.000000e+00> : vector<16x128xf32>
    %15 = tpu.matmul %13, %14, %cst_10 {dimension_numbers = #tpu.dot_dimension_numbers<[1], [0], [0], [1], [0, 0, 1, 1], [], []>} : vector<16x128xf32>, vector<128x128xf32>, vector<16x128xf32> -> vector<16x128xf32>
    %c0_i32 = arith.constant 0 : i32
    %16 = arith.cmpi eq, %arg1, %c0_i32 : i32
    %17 = arith.extui %16 : i1 to i32
    %c0_i32_11 = arith.constant 0 : i32
    %18 = arith.cmpi ne, %17, %c0_i32_11 : i32
    scf.if %18 {
      %c0_16 = arith.constant 0 : index
      %c0_17 = arith.constant 0 : index
      %25 = vector.load %arg6[%c0_16, %c0_17] : memref<1x128xf32, #tpu.memory_space<vmem>>, vector<1x128xf32>
      %26 = vector.broadcast %25 : vector<1x128xf32> to vector<16x128xf32>
      %27 = arith.addf %15, %26 : vector<16x128xf32>
      %c0_18 = arith.constant 0 : index
      %c0_19 = arith.constant 0 : index
      %28 = vector.load %arg8[%c0_18, %c0_19] : memref<16x128xf32, #tpu.memory_space<vmem>>, vector<16x128xf32>
      tpu.vector_store %arg8[%c0_18, %c0_19], %27 {strides = array<i32>} : memref<16x128xf32, #tpu.memory_space<vmem>>, vector<16x128xf32>,
    } else {
    }
    %c0_i32_12 = arith.constant 0 : i32
    %19 = arith.cmpi sgt, %arg1, %c0_i32_12 : i32
    %20 = arith.extui %19 : i1 to i32
    %c0_i32_13 = arith.constant 0 : i32
    %21 = arith.cmpi ne, %20, %c0_i32_13 : i32
    scf.if %21 {
      %c0_16 = arith.constant 0 : index
      %c0_17 = arith.constant 0 : index
      %25 = vector.load %arg8[%c0_16, %c0_17] : memref<16x128xf32, #tpu.memory_space<vmem>>, vector<16x128xf32>
      %26 = arith.addf %25, %15 : vector<16x128xf32>
      %c0_18 = arith.constant 0 : index
      %c0_19 = arith.constant 0 : index
      %27 = vector.load %arg8[%c0_18, %c0_19] : memref<16x128xf32, #tpu.memory_space<vmem>>, vector<16x128xf32>
      tpu.vector_store %arg8[%c0_18, %c0_19], %26 {strides = array<i32>} : memref<16x128xf32, #tpu.memory_space<vmem>>, vector<16x128xf32>,
    } else {
    }
    %c0_i32_14 = arith.constant 0 : i32
    %22 = arith.cmpi eq, %arg1, %c0_i32_14 : i32
    %23 = arith.extui %22 : i1 to i32
    %c0_i32_15 = arith.constant 0 : i32
    %24 = arith.cmpi ne, %23, %c0_i32_15 : i32
    scf.if %24 {
      %c0_16 = arith.constant 0 : index
      %c0_17 = arith.constant 0 : index
      %25 = vector.load %arg8[%c0_16, %c0_17] : memref<16x128xf32, #tpu.memory_space<vmem>>, vector<16x128xf32>
      %c0_18 = arith.constant 0 : index
      %c0_19 = arith.constant 0 : index
      %26 = vector.load %arg7[%c0_18, %c0_19] : memref<16x128xf32, #tpu.memory_space<vmem>>, vector<16x128xf32>
      tpu.vector_store %arg7[%c0_18, %c0_19], %25 {strides = array<i32>} : memref<16x128xf32, #tpu.memory_space<vmem>>, vector<16x128xf32>,
    } else {
    }
    return
  }
  func.func @transform_0(%arg0: i32, %arg1: i32) -> (i32, i32) {
    %c0_i32 = arith.constant 0 : i32
    %c0_i32_0 = arith.constant 0 : i32
    return %arg0, %c0_i32 : i32, i32
  }
  func.func @transform_1(%arg0: i32, %arg1: i32) -> (i32, i32) {
    %c0_i32 = arith.constant 0 : i32
    %c0_i32_0 = arith.constant 0 : i32
    return %c0_i32, %arg1 : i32, i32
  }
  func.func @transform_2(%arg0: i32, %arg1: i32) -> (i32, i32) {
    %c0_i32 = arith.constant 0 : i32
    %c0_i32_0 = arith.constant 0 : i32
    return %c0_i32, %arg1 : i32, i32
  }
  func.func @transform_3(%arg0: i32, %arg1: i32) -> (i32, i32) {
    %c0_i32 = arith.constant 0 : i32
    %c0_i32_0 = arith.constant 0 : i32
    return %arg1, %c0_i32 : i32, i32
  }
  func.func @transform_4(%arg0: i32, %arg1: i32) -> (i32, i32) {
    %c0_i32 = arith.constant 0 : i32
    %c0_i32_0 = arith.constant 0 : i32
    %c0_i32_1 = arith.constant 0 : i32
    return %c0_i32, %c0_i32_0 : i32, i32
  }
  func.func @transform_5(%arg0: i32, %arg1: i32) -> (i32, i32) {
    %c0_i32 = arith.constant 0 : i32
    %c0_i32_0 = arith.constant 0 : i32
    return %arg0, %c0_i32 : i32, i32
  }
}

</mosaic_0001>

<bundles_post_ra>
// kernel: gated_mlp.1
= control target key start
LH: loop header
LB: loop body
LE: loop exit
PB: predicated region body
PF: predicated region fallthrough
CT: control target
= control target key end

     0   :  { %s506_s1 = inlined_call_operand.vmem [shape: f32[256,128], index: 1, kind: input, shape index: {}]   ;;  %s507_s2 = inlined_call_operand.vmem [shape: f32[1,128], index: 2, kind: input, shape index: {}]   ;;  %s508_s0 = inlined_call_operand.vmem [shape: f32[16,256], index: 0, kind: input, shape index: {}]   ;;  %s509_s4 = inlined_call_operand.vmem [shape: f32[1,128], index: 4, kind: input, shape index: {}]   ;;  %s510_s3 = inlined_call_operand.vmem [shape: f32[128,128], index: 3, kind: input, shape index: {}]   ;;  %s511_s5 = inlined_call_operand.vmem [shape: f32[16,128], index: 5, kind: output, shape index: {}]  }
   0x1   :  { %v39_v0 = vld [vmem:[%s506_s1 + $0x78] sm:$0xff]  ;;  %v38_v2 = vld [vmem:[%s506_s1 + $0x70] sm:$0xff]  ;;  %v37_v4 = vld [vmem:[%s506_s1 + $0x68] sm:$0xff] }
   0x2   :  { %v55_v1 = vld [vmem:[%s506_s1 + $0xf8] sm:$0xff]  ;;  %60 = vmatpush.msra.mxu0 %v39_v0  ;;  %268 = vmatpush.msra.mxu3 %v39_v0  ;;  %v54_v3 = vld [vmem:[%s506_s1 + $0xf0] sm:$0xff]  ;;  %v53_v5 = vld [vmem:[%s506_s1 + $0xe8] sm:$0xff] }
   0x3   :  { %83 = vmatpush.msra.mxu1 %v55_v1  ;;  %v36_v6 = vld [vmem:[%s506_s1 + $0x60] sm:$0xff]  ;;  %v35_v8 = vld [vmem:[%s506_s1 + $0x58] sm:$0xff]  ;;  %v34_v10 = vld [vmem:[%s506_s1 + $0x50] sm:$0xff] }
   0x4   :  { %61 = vmatpush.msra.mxu0 %v38_v2  ;;  %269 = vmatpush.msra.mxu3 %v38_v2  ;;  %v52_v7 = vld [vmem:[%s506_s1 + $0xe0] sm:$0xff]  ;;  %v51_v9 = vld [vmem:[%s506_s1 + $0xd8] sm:$0xff]  ;;  %v50_v11 = vld [vmem:[%s506_s1 + $0xd0] sm:$0xff] }
   0x5   :  { %84 = vmatpush.msra.mxu1 %v54_v3  ;;  %v33_v12 = vld [vmem:[%s506_s1 + $0x48] sm:$0xff]  ;;  %v32_v14 = vld [vmem:[%s506_s1 + $0x40] sm:$0xff]  ;;  %v31_v16 = vld [vmem:[%s506_s1 + $0x38] sm:$0xff] }
   0x6   :  { %62 = vmatpush.msra.mxu0 %v37_v4  ;;  %270 = vmatpush.msra.mxu3 %v37_v4  ;;  %v49_v13 = vld [vmem:[%s506_s1 + $0xc8] sm:$0xff]  ;;  %v48_v15 = vld [vmem:[%s506_s1 + $0xc0] sm:$0xff]  ;;  %v47_v17 = vld [vmem:[%s506_s1 + $0xb8] sm:$0xff] }
   0x7   :  { %85 = vmatpush.msra.mxu1 %v53_v5  ;;  %v30_v18 = vld [vmem:[%s506_s1 + $0x30] sm:$0xff]  ;;  %v29_v20 = vld [vmem:[%s506_s1 + $0x28] sm:$0xff]  ;;  %v28_v22 = vld [vmem:[%s506_s1 + $0x20] sm:$0xff] }
   0x8   :  { %63 = vmatpush.msra.mxu0 %v36_v6  ;;  %271 = vmatpush.msra.mxu3 %v36_v6  ;;  %v46_v19 = vld [vmem:[%s506_s1 + $0xb0] sm:$0xff]  ;;  %v45_v21 = vld [vmem:[%s506_s1 + $0xa8] sm:$0xff]  ;;  %v44_v23 = vld [vmem:[%s506_s1 + $0xa0] sm:$0xff] }
   0x9   :  { %86 = vmatpush.msra.mxu1 %v52_v7  ;;  %v27_v24 = vld [vmem:[%s506_s1 + $0x18] sm:$0xff]  ;;  %v26_v26 = vld [vmem:[%s506_s1 + $0x10] sm:$0xff]  ;;  %v25_v28 = vld [vmem:[%s506_s1 + $0x8] sm:$0xff] }
   0xa   :  { %64 = vmatpush.msra.mxu0 %v35_v8  ;;  %272 = vmatpush.msra.mxu3 %v35_v8  ;;  %v43_v25 = vld [vmem:[%s506_s1 + $0x98] sm:$0xff]  ;;  %v42_v27 = vld [vmem:[%s506_s1 + $0x90] sm:$0xff]  ;;  %v41_v29 = vld [vmem:[%s506_s1 + $0x88] sm:$0xff] }
   0xb   :  { %87 = vmatpush.msra.mxu1 %v51_v9  ;;  %v24_v30 = vld [vmem:[%s506_s1] sm:$0xff]  ;;  %v22_v33 = vld [vmem:[%s508_s0 + $0x10] sm:$0xff]  ;;  %v21_v34 = vld [vmem:[%s508_s0 + $0x8] sm:$0xff] }
   0xc   :  { %65 = vmatpush.msra.mxu0 %v34_v10  ;;  %273 = vmatpush.msra.mxu3 %v34_v10  ;;  %v40_v31 = vld [vmem:[%s506_s1 + $0x80] sm:$0xff]  ;;  %v23_v35 = vld [vmem:[%s508_s0 + $0x18] sm:$0xff]  ;;  %v208_v37 = vld [vmem:[%s510_s3 + $0x70] sm:$0xff] }
   0xd   :  { %88 = vmatpush.msra.mxu1 %v50_v11  ;;  %v20_v32 = vld [vmem:[%s508_s0] sm:$0xff]  ;;  %v209_v36 = vld [vmem:[%s510_s3 + $0x78] sm:$0xff]  ;;  %v207_v39 = vld [vmem:[%s510_s3 + $0x68] sm:$0xff] }
   0xe   :  { %66 = vmatpush.msra.mxu0 %v33_v12  ;;  %274 = vmatpush.msra.mxu3 %v33_v12  ;;  %v284_v38 = vld [vmem:[%s507_s2] ss:$0 sm:$0xff]  ;;  %v205_v44 = vld [vmem:[%s510_s3 + $0x58] sm:$0xff]  ;;  %v204_v46 = vld [vmem:[%s510_s3 + $0x50] sm:$0xff] }
   0xf   :  { %89 = vmatpush.msra.mxu1 %v49_v13  ;;  %210 = vmatpush.msra.mxu2 %v209_v36  ;;  %v206_v40 = vld [vmem:[%s510_s3 + $0x60] sm:$0xff]  ;;  %v203_v48 = vld [vmem:[%s510_s3 + $0x48] sm:$0xff]  ;;  %v201_v52 = vld [vmem:[%s510_s3 + $0x38] sm:$0xff] }
  0x10   :  { %67 = vmatpush.msra.mxu0 %v32_v14  ;;  %275 = vmatpush.msra.mxu3 %v32_v14  ;;  %v202_v49 = vld [vmem:[%s510_s3 + $0x40] sm:$0xff]  ;;  %v200_v56 = vld [vmem:[%s510_s3 + $0x30] sm:$0xff]  ;;  %v199_v59 = vld [vmem:[%s510_s3 + $0x28] sm:$0xff] }
  0x11   :  { %90 = vmatpush.msra.mxu1 %v48_v15  ;;  %211 = vmatpush.msra.mxu2 %v208_v37  ;;  %v198_v63 = vld [vmem:[%s510_s3 + $0x20] sm:$0xff]  ;;  %v197_v3 = vld [vmem:[%s510_s3 + $0x18] sm:$0xff]  ;;  %v196_v6 = vld [vmem:[%s510_s3 + $0x10] sm:$0xff] }
  0x12   :  { %68 = vmatpush.msra.mxu0 %v31_v16  ;;  %276 = vmatpush.msra.mxu3 %v31_v16  ;;  %v195_v11 = vld [vmem:[%s510_s3 + $0x8] sm:$0xff]  ;;  %v194_v15 = vld [vmem:[%s510_s3] sm:$0xff] }
  0x13   :  { %91 = vmatpush.msra.mxu1 %v47_v17  ;;  %212 = vmatpush.msra.mxu2 %v207_v39 }
  0x14   :  { %69 = vmatpush.msra.mxu0 %v30_v18  ;;  %277 = vmatpush.msra.mxu3 %v30_v18 }
  0x15   :  { %92 = vmatpush.msra.mxu1 %v46_v19  ;;  %213 = vmatpush.msra.mxu2 %v206_v40 }
  0x16   :  { %70 = vmatpush.msra.mxu0 %v29_v20  ;;  %278 = vmatpush.msra.mxu3 %v29_v20 }
  0x17   :  { %93 = vmatpush.msra.mxu1 %v45_v21  ;;  %214 = vmatpush.msra.mxu2 %v205_v44 }
  0x18   :  { %71 = vmatpush.msra.mxu0 %v28_v22  ;;  %279 = vmatpush.msra.mxu3 %v28_v22 }
  0x19   :  { %94 = vmatpush.msra.mxu1 %v44_v23  ;;  %215 = vmatpush.msra.mxu2 %v204_v46 }
  0x1a   :  { %72 = vmatpush.msra.mxu0 %v27_v24  ;;  %280 = vmatpush.msra.mxu3 %v27_v24 }
  0x1b   :  { %95 = vmatpush.msra.mxu1 %v43_v25  ;;  %216 = vmatpush.msra.mxu2 %v203_v48 }
  0x1c   :  { %73 = vmatpush.msra.mxu0 %v26_v26  ;;  %281 = vmatpush.msra.mxu3 %v26_v26 }
  0x1d   :  { %96 = vmatpush.msra.mxu1 %v42_v27  ;;  %217 = vmatpush.msra.mxu2 %v202_v49 }
  0x1e   :  { %74 = vmatpush.msra.mxu0 %v25_v28  ;;  %282 = vmatpush.msra.mxu3 %v25_v28 }
  0x1f   :  { %97 = vmatpush.msra.mxu1 %v41_v29  ;;  %218 = vmatpush.msra.mxu2 %v201_v52 }
  0x20   :  { %75 = vmatpush.msra.mxu0 %v24_v30  ;;  %283 = vmatpush.msra.mxu3 %v24_v30 }
  0x21   :  { %98 = vmatpush.msra.mxu1 %v40_v31  ;;  %76 = vmatmul.f32.vlgmr.msra.gmra.mxu0 %v20_v32 }
  0x22   :  { %79 = vmatmul.f32.vlgmr.msra.gmra.mxu3 %v22_v33  ;;  %99 = vmatmul.f32.vlgmr.msra.gmra.mxu1 %v21_v34 }
  0x23   :  { %219 = vmatpush.msra.mxu2 %v200_v56 }
  0x25   :  { %220 = vmatpush.msra.mxu2 %v199_v59 }
  0x27   :  { %221 = vmatpush.msra.mxu2 %v198_v63 }
  0x29   :  { %222 = vmatpush.msra.mxu2 %v197_v3 }
  0x2a   :  { %102 = vmatmul.f32.gmra.mxu1 %v23_v35 }
  0x2b   :  { %223 = vmatpush.msra.mxu2 %v196_v6 }
  0x2d   :  { %224 = vmatpush.msra.mxu2 %v195_v11 }
  0x2f   :  { %225 = vmatpush.msra.mxu2 %v194_v15 }
  0x9e   :  { %v77_v41 = vpop.f32.mrf.mxu0 }
  0x9f   :  { %v78_v42 = vadd.f32 %v284_v38, %v77_v41  ;;  %v100_v43 = vpop.f32.mrf.mxu1 }
  0xa1   :  { %v446_v45 = vadd.f32 %v100_v43, %v78_v42 }
  0xa3   :  { %v452_v47 = vmul.f32 0.70710677, %v446_v45  ;;  %v106_v3 = vmul.f32 0.5, %v446_v45  ;;  %v285_v45 = vld [vmem:[%s509_s4] ss:$0 sm:$0xff] }
  0xa5   :  { %v110_v50 = vmul.f32 %v452_v47, %v452_v47  ;;  %v80_v51 = vpop.f32.mrf.mxu3 }
  0xa6   :  { %v81_v53 = vadd.f32 %v284_v38, %v80_v51 }
  0xa7   :  { %v111_v54 = vmin.f32 %v110_v50, 16.0  ;;  %v103_v55 = vpop.f32.mrf.mxu1 }
  0xa8   :  { %v468_v57 = vadd.f32 %v103_v55, %v81_v53 }
  0xa9   :  { %v112_v58 = vmul.f32 2.1237322e-06, %v111_v54  ;;  %v123_v60 = vmul.f32 3.8918573e-05, %v111_v54 }
  0xaa   :  { %v474_v61 = vmul.f32 0.70710677, %v468_v57 }
  0xab   :  { %v113_v62 = vadd.f32 0.00028619796, %v112_v58  ;;  %v124_v0 = vadd.f32 0.001143296, %v123_v60 }
  0xac   :  { %v150_v1 = vmul.f32 %v474_v61, %v474_v61 }
  0xad   :  { %v114_v2 = vmul.f32 %v113_v62, %v111_v54  ;;  %v125_v4 = vmul.f32 %v124_v0, %v111_v54 }
  0xae   :  { %v151_v5 = vmin.f32 %v150_v1, 16.0 }
  0xaf   :  { %v126_v7 = vadd.f32 0.014752088, %v125_v4  ;;  %v115_v8 = vadd.f32 0.0036580483, %v114_v2 }
  0xb0   :  { %v152_v9 = vmul.f32 2.1237322e-06, %v151_v5  ;;  %v163_v10 = vmul.f32 3.8918573e-05, %v151_v5 }
  0xb1   :  { %v127_v12 = vmul.f32 %v126_v7, %v111_v54  ;;  %v116_v17 = vmul.f32 %v115_v8, %v111_v54 }
  0xb2   :  { %v153_v13 = vadd.f32 0.00028619796, %v152_v9  ;;  %v164_v14 = vadd.f32 0.001143296, %v163_v10 }
  0xb3   :  { %v128_v16 = vadd.f32 0.112945676, %v127_v12  ;;  %v117_v24 = vadd.f32 0.05243302, %v116_v17  ;;  %v107_v12 = vmul.f32 0.5, %v468_v57 }
  0xb4   :  { %v154_v18 = vmul.f32 %v153_v13, %v151_v5  ;;  %v165_v19 = vmul.f32 %v164_v14, %v151_v5 }
  0xb5   :  { %v129_v20 = vmul.f32 %v128_v16, %v111_v54  ;;  %v118_v30 = vmul.f32 %v117_v24, %v111_v54 }
  0xb6   :  { %v166_v21 = vadd.f32 0.014752088, %v165_v19  ;;  %v155_v22 = vadd.f32 0.0036580483, %v154_v18 }
  0xb7   :  { %v130_v23 = vadd.f32 0.4994258, %v129_v20  ;;  %v119_v34 = vadd.f32 0.18741608, %v118_v30 }
  0xb8   :  { %v167_v25 = vmul.f32 %v166_v21, %v151_v5  ;;  %v156_v28 = vmul.f32 %v155_v22, %v151_v5 }
  0xb9   :  { %v131_v26 = vmul.f32 %v130_v23, %v111_v54  ;;  %v120_v39 = vmul.f32 %v119_v34, %v111_v54 }
  0xba   :  { %v168_v27 = vadd.f32 0.112945676, %v167_v25  ;;  %v157_v33 = vadd.f32 0.05243302, %v156_v28 }
  0xbb   :  { %v132_v29 = vadd.f32 1.0, %v131_v26  ;;  %v121_v44 = vadd.f32 1.1283791, %v120_v39 }
  0xbc   :  { %v169_v31 = vmul.f32 %v168_v27, %v151_v5  ;;  %v158_v38 = vmul.f32 %v157_v33, %v151_v5 }
  0xbd   :  { %286 = vrcp.f32 %v132_v29  ;;  %v144_v43 = vand.u32 2147483648, %v132_v29  ;;  %v142_v48 = vand.u32 2147483647, %v132_v29  ;;  %vm138_vm1 = vweird.f32 %v132_v29 }
  0xbe   :  { %v170_v32 = vadd.f32 0.4994258, %v169_v31  ;;  %v159_v42 = vadd.f32 0.18741608, %v158_v38  ;;  %v122_v55 = vmul.f32 %v121_v44, %v452_v47 }
  0xbf   :  { %v145_v52 = vor.u32 1.1754944e-38, %v144_v43  ;;  %vm143_vm3 = vcmp.eq.f32.partialorder %v142_v48, 8.507059e+37 }
  0xc0   :  { %v171_v35 = vmul.f32 %v170_v32, %v151_v5  ;;  %v160_v51 = vmul.f32 %v159_v42, %v151_v5 }
  0xc2   :  { %v172_v36 = vadd.f32 1.0, %v171_v35  ;;  %v161_v62 = vadd.f32 1.1283791, %v160_v51 }
  0xc3   :  { %v287_v37 = vpop.eup %286 }
  0xc4   :  { %v134_v40 = vmul.f32 %v287_v37, %v132_v29  ;;  %288 = vrcp.f32 %v172_v36  ;;  %vm139_vm0 = vweird.f32 %v287_v37  ;;  %v184_v60 = vand.u32 2147483648, %v172_v36 }
  0xc5   :  { %vm140_vm2 = vmor %vm138_vm1, %vm139_vm0  ;;  %v182_v0 = vand.u32 2147483647, %v172_v36  ;;  %vm178_vm5 = vweird.f32 %v172_v36  ;;  %v162_v47 = vmul.f32 %v161_v62, %v474_v61 }
  0xc6   :  { %v135_v41 = vsub.f32 1.0, %v134_v40  ;;  %v185_v5 = vor.u32 1.1754944e-38, %v184_v60 }
  0xc7   :  { %vm183_vm7 = vcmp.eq.f32.partialorder %v182_v0, 8.507059e+37 }
  0xc8   :  { %v136_v46 = vmul.f32 %v287_v37, %v135_v41 }
  0xca   :  { %v289_v49 = vpop.eup %288  ;;  %v137_v50 = vadd.f32 %v287_v37, %v136_v46 }
  0xcb   :  { %v174_v53 = vmul.f32 %v289_v49, %v172_v36  ;;  %vm179_vm4 = vweird.f32 %v289_v49 }
  0xcc   :  { %v141_v56 = vsel %vm140_vm2, %v287_v37, %v137_v50  ;;  %vm180_vm6 = vmor %vm178_vm5, %vm179_vm4 }
  0xcd   :  { %v146_v54 = vsel %vm143_vm3, %v145_v52, %v141_v56  ;;  %v175_v58 = vsub.f32 1.0, %v174_v53 }
  0xce   :  { %v147_v59 = vmul.f32 %v146_v54, %v122_v55 }
  0xcf   :  { %v176_v63 = vmul.f32 %v289_v49, %v175_v58 }
  0xd0   :  { %v266_v1 = vclamps-f32 %v147_v59, 1.0 }
  0xd1   :  { %v177_v2 = vadd.f32 %v289_v49, %v176_v63 }
  0xd2   :  { %v190_v4 = vadd.f32 1.0, %v266_v1 }
  0xd3   :  { %v181_v6 = vsel %vm180_vm6, %v289_v49, %v177_v2 }
  0xd4   :  { %v192_v7 = vmul.f32 %v190_v4, %v106_v3  ;;  %v186_v8 = vsel %vm183_vm7, %v185_v5, %v181_v6 }
  0xd5   :  { %v187_v9 = vmul.f32 %v186_v8, %v162_v47 }
  0xd6   :  { %226 = vmatmul.f32.vlgmr.msra.gmra.mxu2 %v192_v7 }
  0xd7   :  { %v267_v10 = vclamps-f32 %v187_v9, 1.0 }
  0xd9   :  { %v191_v11 = vadd.f32 1.0, %v267_v10 }
  0xdb   :  { %v193_v13 = vmul.f32 %v191_v11, %v107_v12 }
  0xde   :  { %229 = vmatmul.f32.gmra.mxu2 %v193_v13 }
 0x159   :  { %v227_v14 = vpop.f32.mrf.mxu2 }
 0x15a   :  { %v241_v15 = vadd.f32 %v285_v45, %v227_v14 }
 0x15c   :  { %260 = vst [vmem:[%s511_s5] sm:$0xff] %v241_v15 }
 0x161   :  { %v230_v61 = vpop.f32.mrf.mxu2 }
 0x162   :  { %v242_v16 = vadd.f32 %v285_v45, %v230_v61 }
 0x164   :  { %261 = vst [vmem:[%s511_s5 + $0x8] sm:$0xff] %v242_v16 }

</bundles_post_ra>
